<compile_context>
chip_gen: v7x
topology: tpu7x:2x2x1
jax: 0.10.0
libtpu: 0.0.40
codegen_flags: <defaults>
</compile_context>

<pallas_src>
import functools

import jax
import jax.numpy as jnp
from jax.experimental import pallas as pl
from jax.experimental.pallas import tpu as pltpu


def _dropout_kernel(x_ref, bits_ref, o_ref, *, threshold, multiplier):
    # torch semantics: keep element iff uniform(0,1) > p.
    # With bits ~ U[0, 2^32) this is bits > p * 2^32 (integer compare, all 32 bits).
    keep = bits_ref[...] > jnp.uint32(threshold)
    scaled = x_ref[...] * jnp.asarray(multiplier, dtype=x_ref.dtype)
    o_ref[...] = jnp.where(keep, scaled, jnp.zeros_like(scaled))


def _random_bits(seed, shape):
    """Deterministic uint32 stream for the dropout mask (shared with the reference)."""
    key = jax.random.PRNGKey(seed)
    return jax.random.bits(key, shape, dtype=jnp.uint32)


def _choose_tiles(b, f, dtype):
    """Lane-dense tiles sized ~2-4 MiB so double-buffered in+bits+out fits VMEM
    on v5e/v6e and on v7x's halved (64 MiB) VMEM."""
    # Lane axis: keep the full feature extent unless it is large and cleanly
    # divisible into 1024-wide (multiple-of-128) tiles.  Never go below 128
    # lanes (avoids masked vst.msk partial stores).
    if f > 2048 and f % 1024 == 0:
        tf = 1024
    else:
        tf = f
    # Sublane axis: chunks of up to 512 rows (multiple of 8 for f32, 16 for
    # bf16), or the whole extent if smaller.
    tb = b if b <= 512 else 512
    return tb, tf


def my_dropout(x, seed, p=0.5, training=True):
    """JAX/Pallas equivalent of MyDropout.forward.

    x: float activation tensor (last dim = features); seed: python int.
    """
    if not training:
        return x
    multiplier = 1.0 / (1.0 - p) if p < 1.0 else 0.0
    threshold = min(int(round(float(p) * 2.0 ** 32)), 2 ** 32 - 1)

    orig_shape = x.shape
    x2 = x if x.ndim == 2 else x.reshape(-1, orig_shape[-1])
    B, F = x2.shape

    bits = _random_bits(seed, (B, F))

    tb, tf = _choose_tiles(B, F, x2.dtype)
    grid = (pl.cdiv(B, tb), pl.cdiv(F, tf))
    blk = lambda: pl.BlockSpec((tb, tf), lambda i, j: (i, j))

    kernel = functools.partial(
        _dropout_kernel, threshold=threshold, multiplier=float(multiplier))

    x_bytes = x2.size * x2.dtype.itemsize
    out = pl.pallas_call(
        kernel,
        out_shape=jax.ShapeDtypeStruct((B, F), x2.dtype),
        grid=grid,
        in_specs=[blk(), blk()],
        out_specs=blk(),
        compiler_params=pltpu.CompilerParams(
            dimension_semantics=("parallel", "parallel")),
        cost_estimate=pl.CostEstimate(
            flops=2 * x2.size,
            transcendentals=0,
            bytes_accessed=2 * x_bytes + x2.size * 4),  # x in, out, bits in
    )(x2, bits)

    return out.reshape(orig_shape)


if __name__ == "__main__":
    key = jax.random.PRNGKey(0)
    batch, features = 8, 128  # small MLP-activation-shaped input
    x = jax.random.normal(key, (batch, features), dtype=jnp.float32)

    p, seed = 0.5, 0
    y = jax.block_until_ready(my_dropout(x, seed=seed, p=p, training=True))

    # Exact reference using the same random bit stream / threshold.
    mult = 1.0 / (1.0 - p)
    thr = min(int(round(p * 2.0 ** 32)), 2 ** 32 - 1)
    bits = _random_bits(seed, (batch, features))
    expected = jnp.where(bits > jnp.uint32(thr), x * mult, 0.0).astype(x.dtype)

    assert y.shape == x.shape and y.dtype == x.dtype
    assert jnp.allclose(y, expected, rtol=1e-6, atol=1e-6)

    # Eval mode is identity.
    assert jnp.array_equal(my_dropout(x, seed=seed, p=p, training=False), x)

    # Roughly half the elements should be dropped for p=0.5.
    frac_kept = float(jnp.mean((y != 0.0).astype(jnp.float32)))
    assert 0.3 <= frac_kept <= 0.7

    print("KERNEL_OK")
</pallas_src>

<mosaic_0001>
module attributes {stable_mosaic.version = 11 : i64} {
  func.func @_dropout_kernel(%arg0: i32, %arg1: i32, %arg2: memref<8x128xf32, #tpu.memory_space<vmem>>, %arg3: memref<8x128xi32, #tpu.memory_space<vmem>>, %arg4: memref<8x128xf32, #tpu.memory_space<vmem>>) attributes {dimension_semantics = [#tpu.dimension_semantics<parallel>, #tpu.dimension_semantics<parallel>], iteration_bounds = array<i64: 1, 1>, scalar_prefetch = 0 : i64, scratch_operands = 0 : i64, tpu.core_type = #tpu.core_type<tc>, window_params = [{transform_indices = @transform_0, window_bounds = array<i64: 8, 128>}, {transform_indices = @transform_1, window_bounds = array<i64: 8, 128>}, {transform_indices = @transform_2, window_bounds = array<i64: 8, 128>}]} {
    %c0 = arith.constant 0 : index
    %c0_0 = arith.constant 0 : index
    %0 = vector.load %arg3[%c0, %c0_0] : memref<8x128xi32, #tpu.memory_space<vmem>>, vector<8x128xi32>
    %c-2147483648_i32 = arith.constant -2147483648 : i32
    %1 = vector.broadcast %c-2147483648_i32 : i32 to vector<8x128xi32>
    %2 = arith.cmpi ugt, %0, %1 : vector<8x128xi32>
    %c0_1 = arith.constant 0 : index
    %c0_2 = arith.constant 0 : index
    %3 = vector.load %arg2[%c0_1, %c0_2] : memref<8x128xf32, #tpu.memory_space<vmem>>, vector<8x128xf32>
    %cst = arith.constant 2.000000e+00 : f32
    %4 = vector.broadcast %cst : f32 to vector<8x128xf32>
    %5 = arith.mulf %3, %4 : vector<8x128xf32>
    %cst_3 = arith.constant 0.000000e+00 : f32
    %6 = vector.broadcast %cst_3 : f32 to vector<8x128xf32>
    %7 = arith.select %2, %5, %6 : vector<8x128xi1>, vector<8x128xf32>
    %c0_4 = arith.constant 0 : index
    %c0_5 = arith.constant 0 : index
    %8 = vector.load %arg4[%c0_4, %c0_5] : memref<8x128xf32, #tpu.memory_space<vmem>>, vector<8x128xf32>
    tpu.vector_store %arg4[%c0_4, %c0_5], %7 {strides = array<i32>} : memref<8x128xf32, #tpu.memory_space<vmem>>, vector<8x128xf32>,
    return
  }
  func.func @transform_0(%arg0: i32, %arg1: i32) -> (i32, i32) {
    %c0_i32 = arith.constant 0 : i32
    return %arg0, %arg1 : i32, i32
  }
  func.func @transform_1(%arg0: i32, %arg1: i32) -> (i32, i32) {
    %c0_i32 = arith.constant 0 : i32
    return %arg0, %arg1 : i32, i32
  }
  func.func @transform_2(%arg0: i32, %arg1: i32) -> (i32, i32) {
    %c0_i32 = arith.constant 0 : i32
    return %arg0, %arg1 : i32, i32
  }
}

</mosaic_0001>

<bundles_post_ra>
// kernel: tpu_custom_call.1
= control target key start
LH: loop header
LB: loop body
LE: loop exit
PB: predicated region body
PF: predicated region fallthrough
CT: control target
= control target key end

     0   :  { %7 = vsyncpa [#allocation3], 0  ;;  %s187_s0 = inlined_call_operand.hbm [shape: f32[8,128], index: 0, kind: input, shape index: {}]   ;;  %s188_s1 = inlined_call_operand.hbm [shape: u32[8,128], index: 1, kind: input, shape index: {}]   ;;  %s189_s2 = inlined_call_operand.hbm [shape: f32[8,128], index: 2, kind: output, shape index: {}]  }
   0x1   :  { %8 = vsyncpa [#allocation6], 0 }
   0x2   :  { %9 = vsyncpa [#allocation4], 0  ;;  %s133_s9 = smov [#allocation2]   ;;  %s134_s11 = smov [#allocation5]  }
   0x3   :  { %s16_s10 = sshll.u32 %s133_s9, 4  ;;  %s26_s12 = sshll.u32 %s134_s11, 4  ;;  %s17_s10 = int_to_ptr.vmem [resolvable:$true] %s16_s10  ;;  %s27_s12 = int_to_ptr.vmem [resolvable:$true] %s26_s12 }
   0x4   :  { %s61_s15 = scalar_lea.hbm %s187_s0, 128 }
   0x5   :  { %p62_p0 = scmp.ne.s32.totalorder %s187_s0, %s61_s15  ;;  %p65_p1 = scmp.lt.u32.totalorder %s61_s15, %s187_s0 }
   0x7   :  { %p67_p2 = pnand %p65_p1, %p62_p0 }
   0x9   :  { %70 = shalt.err (!%p67_p2)
}
   0xa   :  { %s71_s20 = scalar_lea.vmem %s17_s10, 128  ;;  %p76_p4 = scmp.lt.s32.totalorder %s17_s10, %s17_s10 }
   0xb   :  { %p72_p3 = scmp.ne.s32.totalorder %s17_s10, %s71_s20  ;;  %p77_p5 = scmp.lt.s32.totalorder %s71_s20, %s71_s20 }
   0xd   :  { %p78_p6 = por %p77_p5, %p76_p4 }
   0xf   :  { %p79_p7 = pnand %p78_p6, %p72_p3 }
  0x11   :  { %82 = shalt.err (!%p79_p7)
}
  0x12   :  { %19 = dma.hbm_to_vmem [thread:$0]  %s187_s0, 128, %s17_s10, [#allocation3]  }
  0x13   :  { %s83_s25 = scalar_lea.hbm %s188_s1, 128 }
  0x14   :  { %p84_p8 = scmp.ne.s32.totalorder %s188_s1, %s83_s25  ;;  %p87_p9 = scmp.lt.u32.totalorder %s83_s25, %s188_s1 }
  0x16   :  { %p89_p10 = pnand %p87_p9, %p84_p8 }
  0x18   :  { %92 = shalt.err (!%p89_p10)
}
  0x19   :  { %s93_s30 = scalar_lea.vmem %s27_s12, 128  ;;  %p98_p12 = scmp.lt.s32.totalorder %s27_s12, %s27_s12 }
  0x1a   :  { %p94_p11 = scmp.ne.s32.totalorder %s27_s12, %s93_s30  ;;  %p99_p13 = scmp.lt.s32.totalorder %s93_s30, %s93_s30 }
  0x1c   :  { %p100_p0 = por %p99_p13, %p98_p12 }
  0x1e   :  { %p101_p1 = pnand %p100_p0, %p94_p11 }
  0x20   :  { %104 = shalt.err (!%p101_p1)
}
  0x21   :  { %29 = dma.hbm_to_vmem [thread:$0]  %s188_s1, 128, %s27_s12, [#allocation6]  }
  0x22   :  { %127 = dma.done.wait [#allocation3], 128  }
  0x23   :  { %128 = vsyncadd [#allocation3], 4294967168 }
  0x24   :  { %129 = dma.done.wait [#allocation6], 128  }
  0x25   :  { %130 = vsyncadd [#allocation6], 4294967168  ;;  %s135_s4 = smov [#allocation7]   ;;  %v36_v0 = vld [vmem:[#allocation5] sm:$0xff]  ;;  %v38_v1 = vld [vmem:[#allocation2] sm:$0xff] }
  0x26   :  { %s48_s5 = sshll.u32 %s135_s4, 4  ;;  %vm37_vm0 = vcmp.gt.u32.totalorder %v36_v0, 2147483648  ;;  %v39_v2 = vmul.f32 2.0, %v38_v1  ;;  %s49_s5 = int_to_ptr.vmem [resolvable:$true] %s48_s5 }
  0x27   :  { %s105_s6 = scalar_lea.vmem %s49_s5, 128  ;;  %p110_p3 = scmp.lt.s32.totalorder %s49_s5, %s49_s5 }
  0x28   :  { %v40_v3 = vsel %vm37_vm0, %v39_v2, 0.0  ;;  %p106_p2 = scmp.ne.s32.totalorder %s49_s5, %s105_s6  ;;  %p111_p4 = scmp.lt.s32.totalorder %s105_s6, %s105_s6 }
  0x29   :  { %41 = vst [vmem:[#allocation7] sm:$0xff] %v40_v3 }
  0x2a   :  { %p112_p5 = por %p111_p4, %p110_p3 }
  0x2c   :  { %p113_p6 = pnand %p112_p5, %p106_p2 }
  0x2e   :  { %116 = shalt.err (!%p113_p6)
}
  0x2f   :  { %s117_s8 = scalar_lea.hbm %s189_s2, 128 }
  0x30   :  { %p118_p7 = scmp.ne.s32.totalorder %s189_s2, %s117_s8  ;;  %p121_p8 = scmp.lt.u32.totalorder %s117_s8, %s189_s2 }
  0x32   :  { %p123_p9 = pnand %p121_p8, %p118_p7 }
  0x34   :  { %126 = shalt.err (!%p123_p9)
}
  0x35   :  { %51 = dma.vmem_to_hbm [thread:$0]  %s49_s5, 128, %s189_s2, [#allocation4]  }
  0x36   :  { %131 = dma.done.wait [#allocation4], 128  }
  0x37   :  { %132 = vsyncadd [#allocation4], 4294967168 }
  0x38   :  { %55 = vsyncpa [#allocation3], 1 }
  0x39   :  { %56 = vsyncpa [#allocation6], 1 }
  0x3a   :  { %57 = vsyncpa [#allocation4], 1 }

</bundles_post_ra>
